<compile_context>
chip_gen: v6e
topology: v6e:2x2x1
jax: 0.10.0
libtpu: 0.0.40
codegen_flags: <defaults>
</compile_context>

<pallas_src>
import functools

import jax
import jax.numpy as jnp
from jax.experimental import pallas as pl
from jax.experimental.pallas import tpu as pltpu

_LANE = 128
_TARGET_BLOCK_BYTES = 2 * 1024 * 1024  # ~2 MiB blocks: good roofline point on all gens


def _sublane_multiple(dtype):
    itemsize = jnp.dtype(dtype).itemsize
    if itemsize >= 4:
        return 8
    if itemsize == 2:
        return 16
    return 32


def _activation_kernel(x_ref, o_ref, *, activation_type, negative_slope):
    x = x_ref[...]
    if activation_type == "relu":
        y = jnp.maximum(x, jnp.zeros_like(x))
    elif activation_type == "leaky_relu":
        y = jnp.where(x >= 0, x, x * jnp.asarray(negative_slope, x.dtype))
    elif activation_type == "sigmoid":
        xf = x.astype(jnp.float32) if x.dtype != jnp.float32 else x
        y = jax.nn.sigmoid(xf).astype(x.dtype)
    else:
        raise ValueError("Unsupported activation type")
    o_ref[...] = y


def activation_layer(x, activation_type="relu", negative_slope=0.2):
    """Pallas TPU implementation of ActivationLayer.forward (elementwise)."""
    orig_shape = x.shape
    dtype = x.dtype
    n = x.size
    sub = _sublane_multiple(dtype)
    itemsize = jnp.dtype(dtype).itemsize

    # Pick the widest lane-dense width (multiple of 128) that divides n exactly,
    # so the common aligned case avoids any pad / un-pad copy.
    width = None
    for w in (8 * _LANE, 4 * _LANE, 2 * _LANE, _LANE):
        if n % w == 0:
            width = w
            break

    if width is not None:
        rows = n // width
        slab = x.reshape(rows, width)
        padded = False
    else:
        # Ragged element count: single pad pass, sliced off at the end.
        width = 8 * _LANE
        rows = pl.cdiv(n, width)
        flat = jnp.pad(x.reshape(-1), (0, rows * width - n))
        slab = flat.reshape(rows, width)
        padded = True

    # ~2 MiB block; second-to-last dim is a multiple of the dtype's sublane tile
    # (or equals the full row count, which is always legal).
    max_block_rows = max(sub, (_TARGET_BLOCK_BYTES // itemsize) // width)
    if rows <= max_block_rows:
        block_rows = rows
    else:
        block_rows = (max_block_rows // sub) * sub

    grid = (pl.cdiv(rows, block_rows),)  # partial last block is masked by Pallas

    kernel = functools.partial(
        _activation_kernel,
        activation_type=activation_type,
        negative_slope=negative_slope,
    )

    out = pl.pallas_call(
        kernel,
        out_shape=jax.ShapeDtypeStruct((rows, width), dtype),
        grid_spec=pltpu.PrefetchScalarGridSpec(
            num_scalar_prefetch=0,
            grid=grid,
            in_specs=[pl.BlockSpec((block_rows, width), lambda i: (i, 0))],
            out_specs=pl.BlockSpec((block_rows, width), lambda i: (i, 0)),
        ),
        compiler_params=pltpu.CompilerParams(
            dimension_semantics=("parallel",),
            vmem_limit_bytes=32 * 1024 * 1024,
        ),
    )(slab)

    if padded:
        return out.reshape(-1)[:n].reshape(orig_shape)
    return out.reshape(orig_shape)


if __name__ == "__main__":
    key = jax.random.PRNGKey(0)
    x = jax.random.normal(key, (2, 4, 16, 16), dtype=jnp.float32)  # NCHW

    # relu
    y_relu = jax.block_until_ready(activation_layer(x, "relu"))
    assert jnp.allclose(y_relu, jnp.maximum(x, 0.0), atol=1e-6)

    # leaky_relu(0.2)
    y_lrelu = jax.block_until_ready(activation_layer(x, "leaky_relu"))
    assert jnp.allclose(y_lrelu, jnp.where(x >= 0, x, 0.2 * x), atol=1e-6)

    # sigmoid
    y_sig = jax.block_until_ready(activation_layer(x, "sigmoid"))
    assert jnp.allclose(y_sig, jax.nn.sigmoid(x), atol=1e-5)

    assert y_relu.shape == x.shape and y_relu.dtype == x.dtype

    # Ragged (non-multiple-of-128) fallback path.
    xr = jax.random.normal(jax.random.PRNGKey(1), (3, 5, 7), dtype=jnp.float32)
    yr = jax.block_until_ready(activation_layer(xr, "leaky_relu"))
    assert jnp.allclose(yr, jnp.where(xr >= 0, xr, 0.2 * xr), atol=1e-6)

    # bf16 path (dtype-aware sublane tiling; f32 compute inside the kernel).
    xb = x.astype(jnp.bfloat16)
    yb = jax.block_until_ready(activation_layer(xb, "sigmoid"))
    assert yb.shape == xb.shape and yb.dtype == jnp.bfloat16
    assert jnp.allclose(
        yb.astype(jnp.float32), jax.nn.sigmoid(xb.astype(jnp.float32)), atol=1e-2
    )

    print("KERNEL_OK")
</pallas_src>

<mosaic_0001>
module attributes {stable_mosaic.version = 11 : i64} {
  func.func @_activation_kernel(%arg0: i32, %arg1: memref<2x1024xf32, #tpu.memory_space<vmem>>, %arg2: memref<2x1024xf32, #tpu.memory_space<vmem>>) attributes {dimension_semantics = [#tpu.dimension_semantics<parallel>], iteration_bounds = array<i64: 1>, scalar_prefetch = 0 : i64, scratch_operands = 0 : i64, tpu.core_type = #tpu.core_type<tc>, window_params = [{transform_indices = @transform_0, window_bounds = array<i64: 2, 1024>}, {transform_indices = @transform_1, window_bounds = array<i64: 2, 1024>}]} {
    %c0 = arith.constant 0 : index
    %c0_0 = arith.constant 0 : index
    %0 = vector.load %arg1[%c0, %c0_0] : memref<2x1024xf32, #tpu.memory_space<vmem>>, vector<2x1024xf32>
    %cst = arith.constant 0.000000e+00 : f32
    %1 = vector.broadcast %cst : f32 to vector<2x1024xf32>
    %2 = arith.maximumf %0, %1 : vector<2x1024xf32>
    %c0_1 = arith.constant 0 : index
    %c0_2 = arith.constant 0 : index
    %3 = vector.load %arg2[%c0_1, %c0_2] : memref<2x1024xf32, #tpu.memory_space<vmem>>, vector<2x1024xf32>
    tpu.vector_store %arg2[%c0_1, %c0_2], %2 {strides = array<i32>} : memref<2x1024xf32, #tpu.memory_space<vmem>>, vector<2x1024xf32>,
    return
  }
  func.func @transform_0(%arg0: i32) -> (i32, i32) {
    %c0_i32 = arith.constant 0 : i32
    %c0_i32_0 = arith.constant 0 : i32
    return %arg0, %c0_i32 : i32, i32
  }
  func.func @transform_1(%arg0: i32) -> (i32, i32) {
    %c0_i32 = arith.constant 0 : i32
    %c0_i32_0 = arith.constant 0 : i32
    return %arg0, %c0_i32 : i32, i32
  }
}

</mosaic_0001>

<bundles_post_ra>
// kernel: tpu_custom_call.1
= control target key start
LH: loop header
LB: loop body
LE: loop exit
PB: predicated region body
PF: predicated region fallthrough
CT: control target
= control target key end

     0   :  { %6 = vsyncpa [#allocation3], 0  ;;  %s106_s0 = inlined_call_operand.hbm [shape: f32[2,1024], index: 0, kind: input, shape index: {}]   ;;  %s107_s1 = inlined_call_operand.hbm [shape: f32[2,1024], index: 1, kind: output, shape index: {}]  }
   0x1   :  { %7 = vsyncpa [#allocation4], 0  ;;  %s88_s6 = smov [#allocation2]  }
   0x2   :  { %s14_s7 = sshll.u32 %s88_s6, 4  ;;  %s15_s7 = int_to_ptr.vmem [resolvable:$true] %s14_s7 }
   0x3   :  { %s52_s8 = scalar_lea.vmem %s15_s7, 256  ;;  %p57_p1 = scmp.lt.s32.totalorder %s15_s7, %s15_s7 }
   0x4   :  { %p53_p0 = scmp.ne.s32.totalorder %s15_s7, %s52_s8  ;;  %p58_p2 = scmp.lt.s32.totalorder %s52_s8, %s52_s8 }
   0x6   :  { %p59_p3 = por %p58_p2, %p57_p1 }
   0x8   :  { %p60_p4 = pnand %p59_p3, %p53_p0 }
   0xa   :  { %63 = shalt.err (!%p60_p4)
}
   0xb   :  { %17 = dma.hbm_to_vmem [thread:$0]  %s106_s0, 256, %s15_s7, [#allocation3]  }
   0xc   :  { %84 = dma.done.wait [#allocation3], 256  }
   0xd   :  { %85 = vsyncadd [#allocation3], 4294967040  ;;  %s89_s11 = smov [#allocation5]   ;;  %v21_v0 = vld [vmem:[#allocation2] sm:$0xff]  ;;  %v22_v1 = vld [vmem:[#allocation2 + $0x8] sm:$0xff] }
   0xe   :  { %s33_s12 = sshll.u32 %s89_s11, 4  ;;  %v23_v2 = vmax.f32 %v21_v0, 0.0  ;;  %v24_v3 = vmax.f32 %v22_v1, 0.0  ;;  %s34_s12 = int_to_ptr.vmem [resolvable:$true] %s33_s12 }
   0xf   :  { %s64_s13 = scalar_lea.vmem %s34_s12, 256  ;;  %p69_p6 = scmp.lt.s32.totalorder %s34_s12, %s34_s12 }
  0x10   :  { %25 = vst [vmem:[#allocation5] sm:$0xff] %v23_v2  ;;  %26 = vst [vmem:[#allocation5 + $0x8] sm:$0xff] %v24_v3  ;;  %p65_p5 = scmp.ne.s32.totalorder %s34_s12, %s64_s13  ;;  %p70_p7 = scmp.lt.s32.totalorder %s64_s13, %s64_s13 }
  0x12   :  { %p71_p8 = por %p70_p7, %p69_p6 }
  0x14   :  { %p72_p9 = pnand %p71_p8, %p65_p5 }
  0x16   :  { %75 = shalt.err (!%p72_p9)
}
  0x17   :  { %36 = dma.vmem_to_hbm [thread:$0]  %s34_s12, 256, %s107_s1, [#allocation4]  }
  0x18   :  { %86 = dma.done.wait [#allocation4], 256  }
  0x19   :  { %87 = vsyncadd [#allocation4], 4294967040 }
  0x1a   :  { %40 = vsyncpa [#allocation3], 1 }
  0x1b   :  { %41 = vsyncpa [#allocation4], 1 }

</bundles_post_ra>
